<compile_context>
chip_gen: v5e
topology: v5e:2x2
jax: 0.10.0
libtpu: 0.0.40
codegen_flags: <defaults>
</compile_context>

<pallas_src>
import functools

import jax
import jax.numpy as jnp
from jax import lax
from jax.experimental import pallas as pl
from jax.experimental.pallas import tpu as pltpu


def _pairwise_fold(chunks):
    """Tree-reduce a list of equal-shaped arrays with pairwise VPU adds."""
    while len(chunks) > 1:
        nxt = [chunks[i] + chunks[i + 1] for i in range(0, len(chunks) - 1, 2)]
        if len(chunks) % 2:
            nxt.append(chunks[-1])
        chunks = nxt
    return chunks[0]


def _kd_loss_kernel(x_ref, t_ref, o_ref, *, inv_temp, slab):
    """One batch tile -> an (8, 128) partial block.

    The element sum of the written block equals
        sum_{rows in tile} sum_c q * (log q - log_p)
    (the wrapper applies the T^2 / B scaling).
    """
    f32 = jnp.float32
    tb, C = x_ref.shape
    n_slabs = C // slab

    # ---- pass 1: per-row max of the *raw* logits (VPU max per slab, one XLU
    # reduce at the end).  max(x/T) == max(x)/T for T > 0 and the shifts
    # cancel algebraically, so no scaling is needed here.
    if n_slabs == 1:
        mx_run = x_ref[...]
        mt_run = t_ref[...]
    else:
        def max_body(i, carry):
            mx, mt = carry
            c0 = pl.multiple_of(i * slab, slab)
            return (jnp.maximum(mx, x_ref[:, pl.ds(c0, slab)]),
                    jnp.maximum(mt, t_ref[:, pl.ds(c0, slab)]))
        mx_run, mt_run = lax.fori_loop(
            1, n_slabs, max_body,
            (x_ref[:, pl.ds(0, slab)], t_ref[:, pl.ds(0, slab)]),
            unroll=2)
    mx = jnp.max(mx_run, axis=-1, keepdims=True).astype(f32)   # (tb, 1)
    mt = jnp.max(mt_run, axis=-1, keepdims=True).astype(f32)   # (tb, 1)

    # ---- pass 2: slab-fused accumulation.  Only (tb, slab) f32 accumulators
    # stay live; no full (tb, C) f32 temporaries.
    def slab_terms(c0):
        xs = (x_ref[:, pl.ds(c0, slab)].astype(f32) - mx) * inv_temp
        ts = (t_ref[:, pl.ds(c0, slab)].astype(f32) - mt) * inv_temp
        ex = jnp.exp(xs)                       # EUP
        et = jnp.exp(ts)                       # EUP
        return ex, et, et * (ts - xs)

    if n_slabs == 1:
        sx_acc, st_acc, w_acc = slab_terms(0)
    else:
        def acc_body(i, carry):
            sx, st, w = carry
            c0 = pl.multiple_of(i * slab, slab)
            ex, et, wt = slab_terms(c0)
            return sx + ex, st + et, w + wt
        zero = jnp.zeros((tb, slab), f32)
        sx_acc, st_acc, w_acc = lax.fori_loop(
            0, n_slabs, acc_body, (zero, zero, zero), unroll=2)

    # ---- per-row reductions (widths <= slab, so XLU work is tiny).
    sx_row = jnp.sum(sx_acc, axis=-1, keepdims=True)            # (tb, 1)
    st_row = jnp.sum(st_acc, axis=-1, keepdims=True)            # (tb, 1)
    rc = jnp.log(sx_row) - jnp.log(st_row)                      # (tb, 1)
    w_scaled = w_acc * (1.0 / st_row)        # exact per-row divide, bcast mul

    # ---- lane fold: slab -> 128 with a pairwise tree of tile-aligned adds.
    part = w_scaled
    width = part.shape[-1]
    if width > 128 and width % 128 == 0:
        part = _pairwise_fold(
            [part[:, j * 128:(j + 1) * 128] for j in range(width // 128)])
    elif width > 128:
        # TODO(synk): ragged class counts (>128, not a multiple of 128) take a
        # cross-lane XLU sum; a class-axis grid split would keep these dense.
        part = jnp.sum(part, axis=-1, keepdims=True)

    # ---- row fold: tb -> 8 with a pairwise tree of sublane-aligned adds.
    if tb > 8 and tb % 8 == 0:
        groups = tb // 8
        part = _pairwise_fold([part[r * 8:(r + 1) * 8, :] for r in range(groups)])
        rc8 = _pairwise_fold([rc[r * 8:(r + 1) * 8, :] for r in range(groups)])
    elif tb > 8:
        part = jnp.sum(part, axis=0, keepdims=True)
        rc8 = jnp.sum(rc, axis=0, keepdims=True)
    else:
        rc8 = rc

    pr, pc = part.shape
    rr = rc8.shape[0]
    if (pr, pc) == (8, 128) and rr == 8:
        # Unmasked lane-dense store; the row constant rides in lane 0.
        lane = lax.broadcasted_iota(jnp.int32, (8, 128), 1)
        o_ref[...] = part + jnp.where(lane == 0, rc8, 0.0)
    else:
        # Small / ragged tile fallback (tiny C or tiny B only).
        o_ref[...] = jnp.zeros(o_ref.shape, o_ref.dtype)
        o_ref[0:pr, 0:pc] = part
        o_ref[0:rr, 0:1] = o_ref[0:rr, 0:1] + rc8


def _physical_vmem_bytes():
    """Per-TensorCore physical VMEM, with a conservative fallback."""
    try:
        info = pltpu.get_tpu_info()
        for attr in ("vmem_capacity_bytes", "vmem_bytes", "vmem_size_bytes"):
            v = getattr(info, attr, None)
            if v:
                return int(v)
    except Exception:
        pass
    return 64 * 2 ** 20      # v7x has the smallest per-core VMEM (64 MiB)


def _choose_slab(C):
    """Class-axis chunk width for the in-kernel slab loop."""
    if C <= 512 or C % 128 != 0:
        return C
    for s in (512, 256, 128):
        if C % s == 0:
            return s
    return C


def _estimate_vmem(tile_b, C, itemsize, slab):
    blocks = 2 * 2 * tile_b * C * itemsize          # 2 inputs x double-buffer
    pass1 = 2 * tile_b * slab * itemsize            # running-max carries
    pass2 = 3 * tile_b * slab * 4                   # f32 accumulators
    temps = 6 * tile_b * slab * 4                   # live slab temps (generous)
    out = 2 * 8 * 128 * 4
    return blocks + pass1 + pass2 + temps + out


def _tile_candidates(B, sub, cap):
    cands = [d for d in range(min(cap, B), 0, -1)
             if B % d == 0 and d % sub == 0]
    if not cands:
        cands = [B]          # ragged small batch: single full-B tile
    return cands


def kd_loss(student_logits, teacher_logits, temp_factor, *,
            tile_b=None, vmem_limit_bytes=None, boundary_dtype=None):
    """Pallas implementation of KDLoss.forward for (B, C) logits."""
    assert student_logits.shape == teacher_logits.shape
    assert student_logits.ndim == 2
    temp_factor = float(temp_factor)
    assert temp_factor > 0.0

    if boundary_dtype is not None:
        # Optional HBM-bandwidth lever (biggest win on v5e); kernel math is f32.
        student_logits = student_logits.astype(boundary_dtype)
        teacher_logits = teacher_logits.astype(boundary_dtype)

    B, C = student_logits.shape
    itemsize = jnp.dtype(student_logits.dtype).itemsize
    sub = {4: 8, 2: 16, 1: 32}.get(itemsize, 8)     # packed-sublane multiple
    slab = _choose_slab(C)

    phys = _physical_vmem_bytes()
    hard_cap = min(int(phys * 0.7), phys - (16 << 20))   # explicit headroom

    if tile_b is None:
        # ~4 MiB per input block per step keeps the ~0.35us grid-step overhead
        # negligible without inflating temporaries / vreg pressure.
        block_budget = 4 << 20
        cap = max(1, block_budget // max(C * itemsize, 1))
        cap = max(cap, sub)                         # at least one sublane group
        cap = min(cap, 256)                         # bound in-kernel fold work
        if B >= 2 * sub:
            cap = min(cap, max(B // 2, sub))        # >=2 grid steps (v7x: 2 TCs)
        for d in _tile_candidates(B, sub, cap):
            if _estimate_vmem(d, C, itemsize, slab) <= hard_cap:
                tile_b = d
                break
        if tile_b is None:
            # TODO(synk): split the class axis across grid steps with an online
            # log-sum-exp for vocabularies too large for a single-row block.
            raise ValueError(
                f"KD loss tile for C={C} does not fit in VMEM; class-axis "
                "grid split not implemented.")
    assert B % tile_b == 0, "batch must be divisible by tile_b"
    num_tiles = B // tile_b

    if vmem_limit_bytes is None:
        est = _estimate_vmem(tile_b, C, itemsize, slab)
        vmem_limit_bytes = int(min(hard_cap, max(est + (4 << 20), 32 << 20)))

    kernel = functools.partial(_kd_loss_kernel,
                               inv_temp=1.0 / temp_factor,
                               slab=slab)

    partials = pl.pallas_call(
        kernel,
        out_shape=jax.ShapeDtypeStruct((num_tiles * 8, 128), jnp.float32),
        grid_spec=pltpu.PrefetchScalarGridSpec(
            num_scalar_prefetch=0,
            grid=(num_tiles,),
            in_specs=[
                pl.BlockSpec((tile_b, C), lambda i: (i, 0)),
                pl.BlockSpec((tile_b, C), lambda i: (i, 0)),
            ],
            out_specs=pl.BlockSpec((8, 128), lambda i: (i, 0)),
        ),
        compiler_params=pltpu.CompilerParams(
            dimension_semantics=("parallel",),
            vmem_limit_bytes=vmem_limit_bytes,
        ),
    )(student_logits, teacher_logits)

    # Final glue: reduce the tiny lane-dense partials and apply T^2 / B.
    return jnp.sum(partials) * (temp_factor ** 2) / B


def _kd_loss_ref(student_logits, teacher_logits, temp_factor):
    """Pure-JAX reference matching the PyTorch module."""
    log_p = jax.nn.log_softmax(student_logits / temp_factor, axis=1)
    q = jax.nn.softmax(teacher_logits / temp_factor, axis=1)
    kl = jnp.sum(q * (jnp.log(q) - log_p))
    return kl * temp_factor ** 2 / student_logits.shape[0]


if __name__ == "__main__":
    key = jax.random.PRNGKey(0)
    k1, k2 = jax.random.split(key)

    B, C = 16, 32
    temp_factor = 4.0

    student = jax.random.normal(k1, (B, C), dtype=jnp.float32) * 2.0
    teacher = jax.random.normal(k2, (B, C), dtype=jnp.float32) * 2.0

    loss = kd_loss(student, teacher, temp_factor)
    loss = jax.block_until_ready(loss)

    ref = _kd_loss_ref(student, teacher, temp_factor)
    assert jnp.allclose(loss, ref, rtol=1e-3, atol=1e-5), (loss, ref)

    print("KERNEL_OK")
</pallas_src>

<mosaic_0001>
module attributes {stable_mosaic.version = 11 : i64} {
  func.func @_kd_loss_kernel(%arg0: i32, %arg1: memref<8x32xf32, #tpu.memory_space<vmem>>, %arg2: memref<8x32xf32, #tpu.memory_space<vmem>>, %arg3: memref<8x128xf32, #tpu.memory_space<vmem>>) attributes {dimension_semantics = [#tpu.dimension_semantics<parallel>], iteration_bounds = array<i64: 2>, scalar_prefetch = 0 : i64, scratch_operands = 0 : i64, tpu.core_type = #tpu.core_type<tc>, window_params = [{transform_indices = @transform_0, window_bounds = array<i64: 8, 32>}, {transform_indices = @transform_1, window_bounds = array<i64: 8, 32>}, {transform_indices = @transform_2, window_bounds = array<i64: 8, 128>}]} {
    %c0 = arith.constant 0 : index
    %c0_0 = arith.constant 0 : index
    %0 = vector.load %arg1[%c0, %c0_0] : memref<8x32xf32, #tpu.memory_space<vmem>>, vector<8x32xf32>
    %c0_1 = arith.constant 0 : index
    %c0_2 = arith.constant 0 : index
    %1 = vector.load %arg2[%c0_1, %c0_2] : memref<8x32xf32, #tpu.memory_space<vmem>>, vector<8x32xf32>
    %cst = arith.constant dense<0xFF800000> : vector<8xf32>
    %2 = vector.multi_reduction <maximumf>, %0, %cst [1] : vector<8x32xf32> to vector<8xf32>
    %3 = vector.shape_cast %2 : vector<8xf32> to vector<8x1xf32>
    %cst_3 = arith.constant dense<0xFF800000> : vector<8xf32>
    %4 = vector.multi_reduction <maximumf>, %1, %cst_3 [1] : vector<8x32xf32> to vector<8xf32>
    %5 = vector.shape_cast %4 : vector<8xf32> to vector<8x1xf32>
    %c0_4 = arith.constant 0 : index
    %c0_5 = arith.constant 0 : index
    %6 = vector.load %arg1[%c0_4, %c0_5] : memref<8x32xf32, #tpu.memory_space<vmem>>, vector<8x32xf32>
    %7 = vector.broadcast %3 : vector<8x1xf32> to vector<8x32xf32>
    %8 = arith.subf %6, %7 : vector<8x32xf32>
    %cst_6 = arith.constant 2.500000e-01 : f32
    %9 = vector.broadcast %cst_6 : f32 to vector<8x32xf32>
    %10 = arith.mulf %8, %9 : vector<8x32xf32>
    %c0_7 = arith.constant 0 : index
    %c0_8 = arith.constant 0 : index
    %11 = vector.load %arg2[%c0_7, %c0_8] : memref<8x32xf32, #tpu.memory_space<vmem>>, vector<8x32xf32>
    %12 = vector.broadcast %5 : vector<8x1xf32> to vector<8x32xf32>
    %13 = arith.subf %11, %12 : vector<8x32xf32>
    %cst_9 = arith.constant 2.500000e-01 : f32
    %14 = vector.broadcast %cst_9 : f32 to vector<8x32xf32>
    %15 = arith.mulf %13, %14 : vector<8x32xf32>
    %16 = math.exp %10 : vector<8x32xf32>
    %17 = math.exp %15 : vector<8x32xf32>
    %18 = arith.subf %15, %10 : vector<8x32xf32>
    %19 = arith.mulf %17, %18 : vector<8x32xf32>
    %cst_10 = arith.constant dense<0.000000e+00> : vector<8xf32>
    %20 = vector.multi_reduction <add>, %16, %cst_10 [1] : vector<8x32xf32> to vector<8xf32>
    %21 = vector.shape_cast %20 : vector<8xf32> to vector<8x1xf32>
    %cst_11 = arith.constant dense<0.000000e+00> : vector<8xf32>
    %22 = vector.multi_reduction <add>, %17, %cst_11 [1] : vector<8x32xf32> to vector<8xf32>
    %23 = vector.shape_cast %22 : vector<8xf32> to vector<8x1xf32>
    %24 = math.log %21 : vector<8x1xf32>
    %25 = math.log %23 : vector<8x1xf32>
    %26 = arith.subf %24, %25 : vector<8x1xf32>
    %cst_12 = arith.constant 1.000000e+00 : f32
    %27 = vector.broadcast %cst_12 : f32 to vector<8x1xf32>
    %28 = arith.divf %27, %23 : vector<8x1xf32>
    %29 = vector.broadcast %28 : vector<8x1xf32> to vector<8x32xf32>
    %30 = arith.mulf %19, %29 : vector<8x32xf32>
    %cst_13 = arith.constant 0.000000e+00 : f32
    %31 = vector.broadcast %cst_13 : f32 to vector<8x128xf32>
    %c0_14 = arith.constant 0 : index
    %c0_15 = arith.constant 0 : index
    %32 = vector.load %arg3[%c0_14, %c0_15] : memref<8x128xf32, #tpu.memory_space<vmem>>, vector<8x128xf32>
    tpu.vector_store %arg3[%c0_14, %c0_15], %31 {strides = array<i32>} : memref<8x128xf32, #tpu.memory_space<vmem>>, vector<8x128xf32>,
    %c0_16 = arith.constant 0 : index
    %c0_17 = arith.constant 0 : index
    %33 = vector.load %arg3[%c0_16, %c0_17] : memref<8x128xf32, #tpu.memory_space<vmem>>, vector<8x32xf32>
    tpu.vector_store %arg3[%c0_16, %c0_17], %30 {strides = array<i32>} : memref<8x128xf32, #tpu.memory_space<vmem>>, vector<8x32xf32>,
    %c0_18 = arith.constant 0 : index
    %c0_19 = arith.constant 0 : index
    %34 = vector.load %arg3[%c0_18, %c0_19] : memref<8x128xf32, #tpu.memory_space<vmem>>, vector<8x1xf32>
    %35 = arith.addf %34, %26 : vector<8x1xf32>
    %c0_20 = arith.constant 0 : index
    %c0_21 = arith.constant 0 : index
    %36 = vector.load %arg3[%c0_20, %c0_21] : memref<8x128xf32, #tpu.memory_space<vmem>>, vector<8x1xf32>
    tpu.vector_store %arg3[%c0_20, %c0_21], %35 {strides = array<i32>} : memref<8x128xf32, #tpu.memory_space<vmem>>, vector<8x1xf32>,
    return
  }
  func.func @transform_0(%arg0: i32) -> (i32, i32) {
    %c0_i32 = arith.constant 0 : i32
    %c0_i32_0 = arith.constant 0 : i32
    return %arg0, %c0_i32 : i32, i32
  }
  func.func @transform_1(%arg0: i32) -> (i32, i32) {
    %c0_i32 = arith.constant 0 : i32
    %c0_i32_0 = arith.constant 0 : i32
    return %arg0, %c0_i32 : i32, i32
  }
  func.func @transform_2(%arg0: i32) -> (i32, i32) {
    %c0_i32 = arith.constant 0 : i32
    %c0_i32_0 = arith.constant 0 : i32
    return %arg0, %c0_i32 : i32, i32
  }
}

</mosaic_0001>

<bundles_post_ra>
// kernel: tpu_custom_call.1
= control target key start
LH: loop header
LB: loop body
LE: loop exit
PB: predicated region body
PF: predicated region fallthrough
CT: control target
= control target key end

     0   :  { %7 = vsyncpa [#allocation3], 0  ;;  %s758_s0 = inlined_call_operand.hbm [shape: f32[16,32], index: 0, kind: input, shape index: {}]   ;;  %s759_s1 = inlined_call_operand.hbm [shape: f32[16,32], index: 1, kind: input, shape index: {}]   ;;  %s760_s2 = inlined_call_operand.hbm [shape: f32[16,128], index: 2, kind: output, shape index: {}]  }
   0x1   :  { %9 = vsyncpa [#allocation3 + $0x1], 0 }
   0x2   :  { %10 = vsyncpa [#allocation6], 0 }
   0x3   :  { %12 = vsyncpa [#allocation6 + $0x1], 0 }
   0x4   :  { %13 = vsyncpa [#allocation4], 0 }
   0x5   :  { %15 = vsyncpa [#allocation4 + $0x1], 0  ;;  %s586_s9 = smov 0   ;;  %s588_s10 = smov 0  }
   0x6   :  { %s590_s11 = smov 0   ;;  %s592_s12 = smov 0  }
   0x7 LB: > { %s607_s13 = sadd.s32 4294967295, %s568_s12   ;;  %s361_s14 = sadd.s32 4294967294, %s568_s12   ;;  %s568_s12 = sphi %s592_s12, %s771_s12   ;;  %s564_s11 = sphi %s590_s11, %s770_s11   ;;  %s560_s10 = sphi %s588_s10, %s769_s10   ;;  %s556_s9 = sphi %s586_s9, %s768_s9  }
   0x8   : > { %s611_s15 = sadd.s32 1, %s568_s12   ;;  %s28_s16 = sadd.s32 1, %s564_s11 }
   0x9   : > { %s25_s17 = ssub.s32 %s568_s12, %s611_s15  ;;  %p35_p0 = scmp.ne.s32.totalorder %s564_s11, %s560_s10 }
   0xa   : > { %p26_p1 = scmp.eq.s32.totalorder %s25_s17, 0  ;;  %p36_p2 = scmp.eq.s32.totalorder %s568_s12, 0 }
   0xb   : > { %p41_p3 = scmp.ne.s32.totalorder %s560_s10, %s556_s9  ;;  %p42_p4 = scmp.eq.s32.totalorder %s607_s13, 0 }
   0xc   : > { %s623_s18 = scalar_select %p26_p1, %s564_s11, %s28_s16  }
   0xd   : > { %p625_p5 = por %p36_p2, %p35_p0  ;;  %p629_p6 = por %p42_p4, %p41_p3 }
   0xe   : > { %p91_p7 = scmp.eq.s32.totalorder %s607_s13, 1  ;;  %p97_p8 = scmp.eq.s32.totalorder %s361_s14, 1 }
   0xf   : > { %p393_p10 = scmp.lt.s32.totalorder %s568_s12, 2  ;;  %s645_s23 = sand.u32 1, %s564_s11  }
  0x10   : > { %p636_p11 = por %p91_p7, %p35_p0  ;;  %p640_p12 = por %p97_p8, %p41_p3 }
  0x11   : > { %s365_s24 = sshll.u32 %s568_s12, 3  ;;  %s364_s25 = sshll.u32 %s645_s23, 3 }
  0x12   : > { %s125_s28 = scalar_lea.hbm %s758_s0, %s365_s24  ;;  %s121_s30 = scalar_lea.vmem [#allocation2], %s364_s25 }
  0x13   : > { %s127_s29 = sshll.u32 %s125_s28, 4  ;;  %s129_s3 = sshll.u32 %s121_s30, 4  ;;  %s128_s29 = int_to_ptr.hbm [resolvable:$true] %s127_s29  ;;  %s130_s3 = int_to_ptr.vmem [resolvable:$true] %s129_s3 }
  0x14   : > { %p654_p13 = pnand %p393_p10, %p625_p5  ;;  %p368_p0 = scmp.ge.s32.totalorder %s568_s12, 1 }
  0x15   : > { %p153_p1 = scmp.lt.s32.totalorder %s568_s12, 3  ;;  %s118_s5 = scalar_lea.sflag [#allocation3], %s645_s23 }
  0x16   : > { %s438_s6 = sshra.s32 %s128_s29, 4  ;;  %p442_p3 = pneg %p654_p13  ;;  %s439_s6 = int_to_ptr.hbm [resolvable:$true] %s438_s6 }
  0x17   : > { %s440_s7 = scalar_lea.hbm %s439_s6, 8  ;;  %s445_s16 = scalar_lea.hbm %s758_s0, 16 }
  0x18   : > { %p441_p2 = scmp.ne.s32.totalorder %s439_s6, %s440_s7  ;;  %p446_p5 = scmp.lt.s32.totalorder %s439_s6, %s758_s0 }
  0x19   : > { %p447_p8 = scmp.lt.s32.totalorder %s445_s16, %s440_s7 }
  0x1a   : > { %p443_p4 = pnand %p442_p3, %p441_p2 }
  0x1b   : > { %p448_p10 = por %p447_p8, %p446_p5 }
  0x1c   : > { %p444_p7 = pneg %p443_p4 }
  0x1e   : > { %p449_p9 = pnand %p448_p10, %p444_p7 }
  0x20   : > { %452 = shalt.err (!%p449_p9)
}
  0x21   : > { %385 = dma.hbm_to_vmem [thread:$0]  (!%p654_p13), %s128_s29, 128, %s130_s3, %s118_s5  }
  0x22   : > { %p678_p2 = pnand %p368_p0, %p153_p1  ;;  %s144_s30 = scalar_lea.hbm %s759_s1, %s365_s24 }
  0x23   : > { %s146_s6 = sshll.u32 %s144_s30, 4  ;;  %s140_s7 = scalar_lea.vmem [#allocation5], %s364_s25  ;;  %s147_s6 = int_to_ptr.hbm [resolvable:$true] %s146_s6 }
  0x24   : > { %s148_s8 = sshll.u32 %s140_s7, 4  ;;  %s137_s14 = scalar_lea.sflag [#allocation6], %s645_s23  ;;  %s149_s8 = int_to_ptr.vmem [resolvable:$true] %s148_s8 }
  0x25   : > { %s468_s16 = sshra.s32 %s147_s6, 4  ;;  %s475_s5 = scalar_lea.hbm %s759_s1, 16  ;;  %s469_s16 = int_to_ptr.hbm [resolvable:$true] %s468_s16 }
  0x26   : > { %s470_s17 = scalar_lea.hbm %s469_s16, 8  ;;  %p476_p4 = scmp.lt.s32.totalorder %s469_s16, %s759_s1 }
  0x27   : > { %p471_p9 = scmp.ne.s32.totalorder %s469_s16, %s470_s17  ;;  %p477_p7 = scmp.lt.s32.totalorder %s475_s5, %s470_s17 }
  0x29   : > { %p473_p0 = pnand %p471_p9, %p442_p3  ;;  %p478_p5 = por %p477_p7, %p476_p4 }
  0x2b   : > { %p474_p1 = pneg %p473_p0 }
  0x2d   : > { %p479_p8 = pnand %p478_p5, %p474_p1 }
  0x2f   : > { %482 = shalt.err (!%p479_p8)
}
  0x30   : > { %388 = dma.hbm_to_vmem [thread:$0]  (!%p654_p13), %s147_s6, 128, %s149_s8, %s137_s14  }
  0x31   : > { %157 = sbr.rel (%p678_p2) target bundleno = 337 (0x151), region = 28  ;;  %s700_s23 = sand.u32 (!%p678_p2), 1, %s560_s10  }
  0x32   : > { %s369_s25 = sshll.u32 (!%p678_p2), %s700_s23, 3  ;;  %s160_s27 = scalar_lea.sflag (!%p678_p2), [#allocation3], %s700_s23 }
  0x33   : > { %s163_s28 = scalar_lea.vmem (!%p678_p2), [#allocation2], %s369_s25 }
  0x36   : > { %543 = dma.done.wait (%p629_p6), %s160_s27, 128  }
  0x37   : > { %545 = vsyncadd (%p629_p6), %s160_s27, 4294967168  ;;  %s170_s4 = scalar_lea.sflag [#allocation6], %s700_s23  ;;  %s173_s30 = scalar_lea.vmem [#allocation5], %s369_s25 }
  0x38   : > { %547 = dma.done.wait (%p629_p6), %s170_s4, 128  }
  0x39   : > { %549 = vsyncadd (%p629_p6), %s170_s4, 4294967168  ;;  %s713_s26 = scalar_lea.vmem [#allocation7], %s369_s25  ;;  %v570_v0 = vmov 0.0   ;;  %vm202_vm0 = vcmask 261120   ;;  %v201_v1 = vld [vmem:[%s173_s30] sm:$0xff]  ;;  %v200_v3 = vld [vmem:[%s163_s28] sm:$0xff] }
  0x3a   : > { %246 = vst [vmem:[%s713_s26] sm:$0xff] %v570_v0  ;;  %v206_v2 = vsel %vm202_vm0, %v201_v1, -inf  ;;  %v203_v4 = vsel %vm202_vm0, %v200_v3, -inf  ;;  %s373_s20 = sshll.u32 %s607_s13, 3  ;;  %s265_s14 = sshll.u32 %s713_s26, 4  ;;  %vm250_vm5 = vcmask 7168   ;;  %s266_s14 = int_to_ptr.vmem [resolvable:$true] %s265_s14 }
  0x3b   : > { %207 = vmax.xlane.f32.xlu0 %v206_v2  ;;  %s263_s8 = scalar_lea.hbm %s760_s2, %s373_s20  ;;  %s253_s13 = scalar_lea.sflag [#allocation4], %s700_s23 }
  0x3c   : > { %s267_s16 = sshll.u32 %s263_s8, 4  ;;  %s518_s19 = scalar_lea.hbm %s760_s2, 16  ;;  %s268_s16 = int_to_ptr.hbm [resolvable:$true] %s267_s16 }
  0x3d   : > { %s512_s17 = sshra.s32 %s268_s16, 4  ;;  %s513_s17 = int_to_ptr.hbm [resolvable:$true] %s512_s17 }
  0x3e   : > { %s514_s29 = scalar_lea.hbm %s513_s17, 8  ;;  %p519_p10 = scmp.lt.s32.totalorder %s513_s17, %s760_s2 }
  0x3f   : > { %p515_p6 = scmp.ne.s32.totalorder %s513_s17, %s514_s29  ;;  %p520_p2 = scmp.lt.s32.totalorder %s518_s19, %s514_s29 }
  0x41   : > { %p516_p13 = pnand %p515_p6, %p636_p11  ;;  %p521_p9 = por %p520_p2, %p519_p10 }
  0x43   : > { %204 = vmax.xlane.f32.xlu0 %v203_v4  ;;  %p517_p3 = pneg %p516_p13 }
  0x45   : > { %p522_p0 = pnand %p521_p9, %p517_p3 }
  0xae   : > { %v208_v5 = vpop.xlane.xlu0 %207 }
  0xaf   : > { %v211_v6 = vsub.f32 %v201_v1, %v208_v5 }
  0xb1   : > { %v212_v7 = vmul.f32 0.25, %v211_v6 }
  0xb3   : > { %v215_v8 = vmul.f32 1.442695, %v212_v7 }
  0xb5   : > { %428 = vpow2.f32 %v215_v8 }
  0xb6   : > { %v205_v9 = vpop.xlane.xlu0 %204 }
  0xb7   : > { %v209_v10 = vsub.f32 %v200_v3, %v205_v9 }
  0xb9   : > { %v210_v11 = vmul.f32 0.25, %v209_v10 }
  0xbb   : > { %v429_v12 = vpop.eup %428  ;;  %v213_v13 = vmul.f32 1.442695, %v210_v11  ;;  %v217_v14 = vsub.f32 %v212_v7, %v210_v11 }
  0xbc   : > { %v222_v15 = vsel %vm202_vm0, %v429_v12, 0.0 }
  0xbd   : > { %430 = vpow2.f32 %v213_v13  ;;  %v218_v16 = vmul.f32 %v429_v12, %v217_v14  ;;  %223 = vadd.xlane.f32.xlu1 %v222_v15 }
  0xc3   : > { %v431_v17 = vpop.eup %430 }
  0xc4   : > { %v219_v18 = vsel %vm202_vm0, %v431_v17, 0.0 }
  0xc5   : > { %220 = vadd.xlane.f32.xlu1 %v219_v18 }
 0x130   : > { %v224_v19 = vpop.xlane.xlu1 %223 }
 0x131   : > { %432 = vrcp.f32 %v224_v19  ;;  %v241_v24 = vand.u32 2147483648, %v224_v19  ;;  %v239_v26 = vand.u32 2147483647, %v224_v19  ;;  %vm235_vm2 = vweird.f32 %v224_v19 }
 0x133   : > { %v242_v28 = vor.u32 1.1754944e-38, %v241_v24  ;;  %vm240_vm4 = vcmp.eq.f32.partialorder %v239_v26, 8.507059e+37 }
 0x137   : > { %v433_v20 = vpop.eup %432 }
 0x138   : > { %v231_v21 = vmul.f32 %v433_v20, %v224_v19  ;;  %v221_v23 = vpop.xlane.xlu1 %220  ;;  %vm236_vm1 = vweird.f32 %v433_v20 }
 0x139   : > { %434 = vlog2.f32 %v221_v23  ;;  %vm237_vm3 = vmor %vm235_vm2, %vm236_vm1 }
 0x13a   : > { %v232_v22 = vsub.f32 1.0, %v231_v21  ;;  %436 = vlog2.f32 %v224_v19 }
 0x13c   : > { %v233_v25 = vmul.f32 %v433_v20, %v232_v22 }
 0x13e   : > { %v234_v27 = vadd.f32 %v433_v20, %v233_v25 }
 0x13f   : > { %v435_v32 = vpop.eup %434 }
 0x140   : > { %v238_v29 = vsel %vm237_vm3, %v433_v20, %v234_v27  ;;  %v437_v33 = vpop.eup %436  ;;  %v226_v34 = vmul.f32 0.6931472, %v435_v32 }
 0x141   : > { %v243_v30 = vsel %vm240_vm4, %v242_v28, %v238_v29  ;;  %v228_v35 = vmul.f32 0.6931472, %v437_v33 }
 0x142   : > { %v245_v31 = vmul.f32 %v243_v30, %v218_v16 }
 0x143   : > { %v229_v36 = vsub.f32 %v226_v34, %v228_v35 }
 0x144   : > { %247 = vst.msk [vmem:[%s713_s26] sm:$0xff] %vm202_vm0, %v245_v31 }
 0x14b   : > { %v248_v37 = vld [vmem:[%s713_s26] sm:$0xff] }
 0x14c   : > { %v249_v38 = vadd.f32 %v248_v37, %v229_v36 }
 0x14e   : > { %251 = vst.msk [vmem:[%s713_s26] sm:$0xff] %vm250_vm5, %v249_v38 }
 0x14f   : > { %525 = shalt.err (!%p522_p0)
}
 0x150   : > { %380 = dma.vmem_to_hbm [thread:$0]  (%p636_p11), %s266_s14, 128, %s268_s16, %s253_s13  }
 0x151 PF: > { %s279_s23 = sand.u32 1, %s556_s9   ;;  %p767_p1 = scmp.ge.s32.totalorder %s568_s12, 2 }
 0x152   : > { %s280_s27 = scalar_lea.sflag [#allocation4], %s279_s23 }
 0x153   : > { %p390_p4 = pnand %p767_p1, %p640_p12 }
 0x155   : > { %p391_p7 = pneg %p390_p4 }
 0x157   : > { %551 = dma.done.wait (%p391_p7), %s280_s27, 128  }
 0x158   : > { %553 = vsyncadd (%p391_p7), %s280_s27, 4294967168  ;;  %p18_p5 = scmp.ge.s32.totalorder %s611_s15, 4   ;;  %s768_s9 = smov %s560_s10 }
 0x159   : > { %s769_s10 = smov %s564_s11  ;;  %s770_s11 = smov %s623_s18 }
 0x15a   : > { %s771_s12 = smov %s611_s15  ;;  %20 = sbr.rel (!%p18_p5) target bundleno = 7 (0x7), region = 86 }
 0x15f   :  { %286 = vsyncpa [#allocation3], 1 }
 0x160   :  { %288 = vsyncpa [#allocation3 + $0x1], 1 }
 0x161   :  { %289 = vsyncpa [#allocation6], 1 }
 0x162   :  { %291 = vsyncpa [#allocation6 + $0x1], 1 }
 0x163   :  { %292 = vsyncpa [#allocation4], 1 }
 0x164   :  { %294 = vsyncpa [#allocation4 + $0x1], 1 }

</bundles_post_ra>
